<compile_context>
chip_gen: v7x
topology: tpu7x:2x2x1
jax: 0.10.0
libtpu: 0.0.40
codegen_flags: <defaults>
</compile_context>

<pallas_src>
import functools

import jax
import jax.numpy as jnp
import numpy as np
from jax.experimental import pallas as pl
from jax.experimental.pallas import tpu as pltpu

HEADS = 4          # ATTENTION_HEADS default in GAT()
NEG_SLOPE = 0.2    # GATConv default negative_slope
LN_EPS = 1e-5      # nn.LayerNorm default eps

_VMEM = pl.BlockSpec(memory_space=pltpu.MemorySpace.VMEM)

RELATIONS = (
    ("station", "can_load", "job"),
    ("station", "loaded", "job"),
    ("machine", "will_execute", "job"),
    ("machine", "execute", "job"),
    ("robot", "hold", "job"),
)


def _align8(x):
    return (x + 7) // 8 * 8


# ------------------------------ Pallas kernel ------------------------------ #

def _job_embedding_kernel(xj_ref, xblk_ref, mask_ref, prm_ref, out_ref, *, lay):
    """Fully lane-packed fused JobEmbedding forward.

    Lane packing of the attention axis: lane l <-> (relation r, head h, src s),
    l = lane_off[r] + h*Ns_r + s, L = sum_r H*Ns_r lanes total.

    xj_ref   : [Nj, Dj]        job (destination) features
    xblk_ref : [G, Dtot]       block-diagonal source features, one row per
                               (relation, source), features in that relation's
                               column block (G = sum_r Ns_r, Dtot = sum_r D_r)
    mask_ref : [Nj, L]         adjacency mask, head-tiled to the lane packing
    prm_ref  : [rows, 128]     packed parameter/constant slab (see prepare_params)
    out_ref  : [Nj, H*C]
    """
    L, HC, G = lay["L"], lay["HC"], lay["G"]
    dj, dtot = lay["Dj"], lay["Dtot"]

    # Static slices of the packed parameter slab (row starts are 8-aligned).
    w_dst = prm_ref[lay["r_wdst"]:lay["r_wdst"] + dj, 0:L + HC]      # [Dj, L+HC]
    w_src = prm_ref[lay["r_wsrc"]:lay["r_wsrc"] + dtot, 0:HC + L]    # [Dtot, HC+L]
    diag_g = prm_ref[lay["r_diag"]:lay["r_diag"] + G, 0:L]           # [G, L]
    g_ones = prm_ref[lay["r_gones"]:lay["r_gones"] + L, 0:L]         # [L, L]
    spread = prm_ref[lay["r_spread"]:lay["r_spread"] + L, 0:G]       # [L, G]
    hmask = prm_ref[lay["r_hmask"]:lay["r_hmask"] + L, 0:HC]         # [L, HC]
    bias = prm_ref[lay["r_vec"] + 0:lay["r_vec"] + 1, 0:HC]          # [1, HC]
    ln_w = prm_ref[lay["r_vec"] + 1:lay["r_vec"] + 2, 0:HC]          # [1, HC]
    ln_b = prm_ref[lay["r_vec"] + 2:lay["r_vec"] + 3, 0:HC]          # [1, HC]

    xj = xj_ref[...]
    xblk = xblk_ref[...]
    mask = mask_ref[...]

    # Destination side: lane-expanded attention logits + residual projection,
    # one matmul (the lane expansion matrix is folded into the weights on host).
    ydst = jnp.dot(xj, w_dst, preferred_element_type=jnp.float32)    # [Nj, L+HC]
    e_dst = ydst[:, 0:L]
    res = ydst[:, L:L + HC]

    # Source side: ONE matmul on the block-diagonal source features yields both
    # the per-(relation,source) projections and the lane-spread source logits.
    ysrc = jnp.dot(xblk, w_src, preferred_element_type=jnp.float32)  # [G, HC+L]
    projcat = ysrc[:, 0:HC]                                          # [G, HC]
    a_src = jnp.sum(ysrc[:, HC:HC + L] * diag_g, axis=0,
                    keepdims=True)                                   # [1, L]

    # LeakyReLU logits, ONE per-row max (uniform per row -> exact for every
    # softmax segment), masked exp, segmented denominators via one 0/1 matmul.
    e = e_dst + a_src
    e = jnp.where(e >= 0.0, e, NEG_SLOPE * e)
    e = e - jnp.max(e, axis=1, keepdims=True)
    p = jnp.exp(e) * mask                                            # [Nj, L]
    denom = jnp.dot(p, g_ones, preferred_element_type=jnp.float32)   # [Nj, L]
    p = p * pl.reciprocal(jnp.where(denom > 0.0, denom, 1.0), approx=True)

    # Block-diagonal value matrix: one matmul + mask, then ONE matmul does the
    # aggregation for all relations and heads, emerging lane-dense [Nj, H*C].
    v_blk = jnp.dot(spread, projcat,
                    preferred_element_type=jnp.float32) * hmask      # [L, HC]
    acc = jnp.dot(p, v_blk, preferred_element_type=jnp.float32) + res + bias

    # ReLU + LayerNorm (biased variance), single store.
    r_ = jnp.maximum(acc, 0.0)
    mu = jnp.mean(r_, axis=-1, keepdims=True)
    var = jnp.mean((r_ - mu) ** 2, axis=-1, keepdims=True)
    y = (r_ - mu) * jax.lax.rsqrt(var + LN_EPS)
    out_ref[...] = y * ln_w + ln_b


# ----------------------- parameter prep (one-time glue) --------------------- #

def prepare_params(params, num_src_nodes, heads=HEADS):
    """Pack every parameter-derived constant into ONE [rows, 128] f32 slab.

    The lane/row packing (and hence the constants) depends on the per-type
    source-node counts (graph topology sizes); re-run when those change — any
    shape change forces an XLA retrace anyway.
    """
    rels = params["relations"]
    hc = params["w_res"].shape[1]
    c = hc // heads
    dj = params["w_res"].shape[0]

    ns = [int(num_src_nodes[r[0]]) for r in RELATIONS]          # sources / rel
    dsrc = [int(rels[r]["w_src"].shape[0]) for r in RELATIONS]  # feat dim / rel
    lane_off = [0]
    g_off = [0]
    d_off = [0]
    for i in range(len(RELATIONS)):
        lane_off.append(lane_off[-1] + heads * ns[i])
        g_off.append(g_off[-1] + ns[i])
        d_off.append(d_off[-1] + dsrc[i])
    L, G, dtot = lane_off[-1], g_off[-1], d_off[-1]

    def fuse(w, att):   # lin weight [D, H*C] + att [H, C] -> fused [D, H]
        d = w.shape[0]
        return np.einsum("dhc,hc->dh",
                         np.asarray(w, np.float32).reshape(d, heads, c),
                         np.asarray(att, np.float32))

    wdst = np.zeros((dj, L + hc), np.float32)       # [A_dst expanded | W_res]
    wsrc = np.zeros((dtot, hc + L), np.float32)     # [W_src stacked | att_src spread]
    diag_g = np.zeros((G, L), np.float32)           # keep lane <-> its own (r,s) row
    g_ones = np.zeros((L, L), np.float32)           # softmax-segment ones blocks
    spread = np.zeros((L, G), np.float32)           # row-select projcat per lane
    hmask = np.zeros((L, hc), np.float32)           # head column mask
    bias = np.zeros((hc,), np.float32)

    for i, rel in enumerate(RELATIONS):
        p = rels[rel]
        ad = fuse(p["w_dst"], p["att_dst"])         # [Dj, H]
        asf = fuse(p["w_src"], p["att_src"])        # [D_i, H]
        bias += np.asarray(p["bias"], np.float32)   # HeteroConv 'sum' of biases
        wsrc[d_off[i]:d_off[i] + dsrc[i], 0:hc] = np.asarray(p["w_src"], np.float32)
        for h in range(heads):
            lo = lane_off[i] + h * ns[i]
            wdst[:, lo:lo + ns[i]] = ad[:, h:h + 1]
            wsrc[d_off[i]:d_off[i] + dsrc[i],
                 hc + lo:hc + lo + ns[i]] = asf[:, h:h + 1]
            g_ones[lo:lo + ns[i], lo:lo + ns[i]] = 1.0
            hmask[lo:lo + ns[i], h * c:(h + 1) * c] = 1.0
            for s in range(ns[i]):
                diag_g[g_off[i] + s, lo + s] = 1.0
                spread[lo + s, g_off[i] + s] = 1.0
    wdst[:, L:L + hc] = np.asarray(params["w_res"], np.float32)

    # Row layout inside the slab (8-aligned starts so in-kernel slices are cheap).
    r_wdst = 0
    r_wsrc = _align8(r_wdst + dj)
    r_diag = _align8(r_wsrc + dtot)
    r_gones = _align8(r_diag + G)
    r_spread = _align8(r_gones + L)
    r_hmask = _align8(r_spread + L)
    r_vec = _align8(r_hmask + L)
    rows = _align8(r_vec + 3)
    lanes = max(128, -(-(L + hc) // 128) * 128)

    slab = np.zeros((rows, lanes), np.float32)
    slab[r_wdst:r_wdst + dj, :L + hc] = wdst
    slab[r_wsrc:r_wsrc + dtot, :hc + L] = wsrc
    slab[r_diag:r_diag + G, :L] = diag_g
    slab[r_gones:r_gones + L, :L] = g_ones
    slab[r_spread:r_spread + L, :G] = spread
    slab[r_hmask:r_hmask + L, :hc] = hmask
    slab[r_vec + 0, :hc] = bias
    slab[r_vec + 1, :hc] = np.asarray(params["ln_w"], np.float32)
    slab[r_vec + 2, :hc] = np.asarray(params["ln_b"], np.float32)

    layout = dict(Dj=dj, Dtot=dtot, G=G, L=L, HC=hc, H=heads,
                  r_wdst=r_wdst, r_wsrc=r_wsrc, r_diag=r_diag,
                  r_gones=r_gones, r_spread=r_spread, r_hmask=r_hmask,
                  r_vec=r_vec)
    return jnp.asarray(slab), layout


# --------------------------------- forward ---------------------------------- #

def build_forward(layout):
    """Returns a jitted forward closed over the static packing layout."""
    kernel = functools.partial(_job_embedding_kernel, lay=layout)
    heads = layout["H"]

    @jax.jit
    def forward(nodes, masks, slab):
        xj = nodes["job"]
        nj = xj.shape[0]
        hc = layout["HC"]

        # Layout plumbing only (tiny, fused by XLA):
        #  * block-diagonal source features: one row per (relation, source),
        #    features placed in that relation's column block,
        #  * adjacency masks tiled per head + lane-concatenated to match the
        #    kernel's (relation, head, source) lane packing.
        xblk = jax.scipy.linalg.block_diag(*[nodes[r[0]] for r in RELATIONS])
        mask_l = jnp.concatenate(
            [jnp.tile(masks[r], (1, heads)) for r in RELATIONS], axis=1)

        flops = 2 * (nj * layout["Dj"] * (layout["L"] + hc)
                     + layout["G"] * layout["Dtot"] * (hc + layout["L"])
                     + nj * layout["L"] * layout["L"]
                     + layout["L"] * layout["G"] * hc
                     + nj * layout["L"] * hc)
        bytes_accessed = 4 * (xj.size + xblk.size + mask_l.size
                              + slab.size + nj * hc)
        cost = pl.CostEstimate(flops=flops,
                               transcendentals=2 * nj * layout["L"] + nj,
                               bytes_accessed=bytes_accessed)

        out = pl.pallas_call(
            kernel,
            out_shape=jax.ShapeDtypeStruct((nj, hc), jnp.float32),
            in_specs=[_VMEM] * 4,
            out_specs=_VMEM,
            compiler_params=pltpu.CompilerParams(
                vmem_limit_bytes=16 * 1024 * 1024),
            cost_estimate=cost,
        )(xj, xblk, mask_l, slab)
        return {"job": out}

    return forward


# ---------------------------- pure-JAX reference ---------------------------- #

def _gat_ref(x_src, x_dst, w_src, w_dst, att_src, att_dst, bias, mask,
             heads=HEADS):
    ns, _ = x_src.shape
    nd, _ = x_dst.shape
    hc = w_src.shape[1]
    c = hc // heads
    xs = (x_src @ w_src).reshape(ns, heads, c)
    xd = (x_dst @ w_dst).reshape(nd, heads, c)
    a_s = (xs * att_src[None]).sum(-1)                              # [Ns, H]
    a_d = (xd * att_dst[None]).sum(-1)                              # [Nd, H]
    e = a_d[:, None, :] + a_s[None, :, :]                           # [Nd, Ns, H]
    e = jnp.where(e >= 0.0, e, NEG_SLOPE * e)
    e = jnp.where(mask[:, :, None] > 0.0, e, -jnp.inf)
    m = jnp.max(e, axis=1, keepdims=True)
    m = jnp.where(jnp.isfinite(m), m, 0.0)
    p = jnp.exp(e - m) * mask[:, :, None]
    denom = p.sum(axis=1, keepdims=True)
    p = p / jnp.where(denom > 0.0, denom, 1.0)
    out = jnp.einsum("nsh,shc->nhc", p, xs).reshape(nd, hc)
    return out + bias[None, :]


def _forward_ref(nodes, masks, params):
    conv_sum = 0.0
    for rel, p in params["relations"].items():
        conv_sum = conv_sum + _gat_ref(nodes[rel[0]], nodes["job"],
                                       p["w_src"], p["w_dst"],
                                       p["att_src"], p["att_dst"],
                                       p["bias"], masks[rel])
    h = conv_sum + nodes["job"] @ params["w_res"]
    r = jnp.maximum(h, 0.0)
    mean = r.mean(-1, keepdims=True)
    var = ((r - mean) ** 2).mean(-1, keepdims=True)
    y = (r - mean) / jnp.sqrt(var + LN_EPS)
    return y * params["ln_w"][None, :] + params["ln_b"][None, :]


# ----------------------------------- main ----------------------------------- #

if __name__ == "__main__":
    key = jax.random.PRNGKey(0)

    # dimensions = (dj, ds, dm, dr); dj != out_dim so the residual Linear is used.
    dj, ds, dm, dr = 12, 10, 9, 7
    out_dim = 16
    n_job, n_station, n_machine, n_robot = 8, 6, 5, 4

    ks = iter(jax.random.split(key, 64))

    nodes = {
        "job":     jax.random.normal(next(ks), (n_job, dj), jnp.float32),
        "station": jax.random.normal(next(ks), (n_station, ds), jnp.float32),
        "machine": jax.random.normal(next(ks), (n_machine, dm), jnp.float32),
        "robot":   jax.random.normal(next(ks), (n_robot, dr), jnp.float32),
    }

    src_dim = {"station": ds, "machine": dm, "robot": dr}
    src_cnt = {"station": n_station, "machine": n_machine, "robot": n_robot}

    c = out_dim // HEADS
    rel_params = {}
    masks = {}
    for rel in RELATIONS:
        d_src = src_dim[rel[0]]
        rel_params[rel] = {
            "w_src":  0.2 * jax.random.normal(next(ks), (d_src, out_dim), jnp.float32),
            "w_dst":  0.2 * jax.random.normal(next(ks), (dj, out_dim), jnp.float32),
            "att_src": 0.2 * jax.random.normal(next(ks), (HEADS, c), jnp.float32),
            "att_dst": 0.2 * jax.random.normal(next(ks), (HEADS, c), jnp.float32),
            "bias":   0.1 * jax.random.normal(next(ks), (out_dim,), jnp.float32),
        }
        masks[rel] = jax.random.bernoulli(
            next(ks), 0.5, (n_job, src_cnt[rel[0]])).astype(jnp.float32)

    params = {
        "relations": rel_params,
        "w_res": 0.2 * jax.random.normal(next(ks), (dj, out_dim), jnp.float32),
        "ln_w": 1.0 + 0.1 * jax.random.normal(next(ks), (out_dim,), jnp.float32),
        "ln_b": 0.1 * jax.random.normal(next(ks), (out_dim,), jnp.float32),
    }

    # One-time parameter packing (outside the per-call hot path).
    slab, layout = prepare_params(params, src_cnt)
    fwd = build_forward(layout)

    out = jax.block_until_ready(fwd(nodes, masks, slab)["job"])
    ref = jax.block_until_ready(_forward_ref(nodes, masks, params))

    assert out.shape == (n_job, out_dim), out.shape
    assert np.all(np.isfinite(np.asarray(out)))
    # Tolerance covers default MXU matmul precision + approx reciprocal vs the
    # XLA f32 reference path.
    np.testing.assert_allclose(np.asarray(out), np.asarray(ref),
                               rtol=1e-2, atol=1e-2)
    print("KERNEL_OK")
</pallas_src>

<mosaic_0001>
module attributes {stable_mosaic.version = 11 : i64} {
  func.func @_job_embedding_kernel(%arg0: memref<8x12xf32, #tpu.memory_space<vmem>>, %arg1: memref<26x45xf32, #tpu.memory_space<vmem>>, %arg2: memref<8x104xf32, #tpu.memory_space<vmem>>, %arg3: memref<416x128xf32, #tpu.memory_space<vmem>>, %arg4: memref<8x16xf32, #tpu.memory_space<vmem>>) attributes {dimension_semantics = [], scalar_prefetch = 0 : i64, scratch_operands = 0 : i64, tpu.core_type = #tpu.core_type<tc>} {
    %c0 = arith.constant 0 : index
    %c0_0 = arith.constant 0 : index
    %0 = vector.load %arg3[%c0, %c0_0] : memref<416x128xf32, #tpu.memory_space<vmem>>, vector<12x120xf32>
    %c16 = arith.constant 16 : index
    %c0_1 = arith.constant 0 : index
    %1 = vector.load %arg3[%c16, %c0_1] : memref<416x128xf32, #tpu.memory_space<vmem>>, vector<45x120xf32>
    %c64 = arith.constant 64 : index
    %c0_2 = arith.constant 0 : index
    %2 = vector.load %arg3[%c64, %c0_2] : memref<416x128xf32, #tpu.memory_space<vmem>>, vector<26x104xf32>
    %c96 = arith.constant 96 : index
    %c0_3 = arith.constant 0 : index
    %3 = vector.load %arg3[%c96, %c0_3] : memref<416x128xf32, #tpu.memory_space<vmem>>, vector<104x104xf32>
    %c200 = arith.constant 200 : index
    %c0_4 = arith.constant 0 : index
    %4 = vector.load %arg3[%c200, %c0_4] : memref<416x128xf32, #tpu.memory_space<vmem>>, vector<104x26xf32>
    %c304 = arith.constant 304 : index
    %c0_5 = arith.constant 0 : index
    %5 = vector.load %arg3[%c304, %c0_5] : memref<416x128xf32, #tpu.memory_space<vmem>>, vector<104x16xf32>
    %c408 = arith.constant 408 : index
    %c0_6 = arith.constant 0 : index
    %6 = vector.load %arg3[%c408, %c0_6] : memref<416x128xf32, #tpu.memory_space<vmem>>, vector<1x16xf32>
    %c409 = arith.constant 409 : index
    %c0_7 = arith.constant 0 : index
    %7 = vector.load %arg3[%c409, %c0_7] : memref<416x128xf32, #tpu.memory_space<vmem>>, vector<1x16xf32>
    %c410 = arith.constant 410 : index
    %c0_8 = arith.constant 0 : index
    %8 = vector.load %arg3[%c410, %c0_8] : memref<416x128xf32, #tpu.memory_space<vmem>>, vector<1x16xf32>
    %c0_9 = arith.constant 0 : index
    %c0_10 = arith.constant 0 : index
    %9 = vector.load %arg0[%c0_9, %c0_10] : memref<8x12xf32, #tpu.memory_space<vmem>>, vector<8x12xf32>
    %c0_11 = arith.constant 0 : index
    %c0_12 = arith.constant 0 : index
    %10 = vector.load %arg1[%c0_11, %c0_12] : memref<26x45xf32, #tpu.memory_space<vmem>>, vector<26x45xf32>
    %c0_13 = arith.constant 0 : index
    %c0_14 = arith.constant 0 : index
    %11 = vector.load %arg2[%c0_13, %c0_14] : memref<8x104xf32, #tpu.memory_space<vmem>>, vector<8x104xf32>
    %cst = arith.constant dense<0.000000e+00> : vector<8x120xf32>
    %12 = tpu.matmul %9, %0, %cst {dimension_numbers = #tpu.dot_dimension_numbers<[1], [0], [0], [1], [0, 0, 1, 1], [], []>} : vector<8x12xf32>, vector<12x120xf32>, vector<8x120xf32> -> vector<8x120xf32>
    %13 = vector.extract_strided_slice %12 {offsets = [0, 0], sizes = [8, 104], strides = [1, 1]} : vector<8x120xf32> to vector<8x104xf32>
    %14 = vector.extract_strided_slice %12 {offsets = [0, 104], sizes = [8, 16], strides = [1, 1]} : vector<8x120xf32> to vector<8x16xf32>
    %cst_15 = arith.constant dense<0.000000e+00> : vector<26x120xf32>
    %15 = tpu.matmul %10, %1, %cst_15 {dimension_numbers = #tpu.dot_dimension_numbers<[1], [0], [0], [1], [0, 0, 1, 1], [], []>} : vector<26x45xf32>, vector<45x120xf32>, vector<26x120xf32> -> vector<26x120xf32>
    %16 = vector.extract_strided_slice %15 {offsets = [0, 0], sizes = [26, 16], strides = [1, 1]} : vector<26x120xf32> to vector<26x16xf32>
    %17 = vector.extract_strided_slice %15 {offsets = [0, 16], sizes = [26, 104], strides = [1, 1]} : vector<26x120xf32> to vector<26x104xf32>
    %18 = arith.mulf %17, %2 : vector<26x104xf32>
    %cst_16 = arith.constant dense<0.000000e+00> : vector<104xf32>
    %19 = vector.multi_reduction <add>, %18, %cst_16 [0] : vector<26x104xf32> to vector<104xf32>
    %20 = vector.shape_cast %19 : vector<104xf32> to vector<1x104xf32>
    %21 = vector.broadcast %20 : vector<1x104xf32> to vector<8x104xf32>
    %22 = arith.addf %13, %21 : vector<8x104xf32>
    %cst_17 = arith.constant 0.000000e+00 : f32
    %23 = vector.broadcast %cst_17 : f32 to vector<8x104xf32>
    %24 = arith.cmpf oge, %22, %23 : vector<8x104xf32>
    %cst_18 = arith.constant 2.000000e-01 : f32
    %25 = vector.broadcast %cst_18 : f32 to vector<8x104xf32>
    %26 = arith.mulf %25, %22 : vector<8x104xf32>
    %27 = arith.select %24, %22, %26 : vector<8x104xi1>, vector<8x104xf32>
    %cst_19 = arith.constant dense<0xFF800000> : vector<8xf32>
    %28 = vector.multi_reduction <maximumf>, %27, %cst_19 [1] : vector<8x104xf32> to vector<8xf32>
    %29 = vector.shape_cast %28 : vector<8xf32> to vector<8x1xf32>
    %30 = vector.broadcast %29 : vector<8x1xf32> to vector<8x104xf32>
    %31 = arith.subf %27, %30 : vector<8x104xf32>
    %32 = math.exp %31 : vector<8x104xf32>
    %33 = arith.mulf %32, %11 : vector<8x104xf32>
    %cst_20 = arith.constant dense<0.000000e+00> : vector<8x104xf32>
    %34 = tpu.matmul %33, %3, %cst_20 {dimension_numbers = #tpu.dot_dimension_numbers<[1], [0], [0], [1], [0, 0, 1, 1], [], []>} : vector<8x104xf32>, vector<104x104xf32>, vector<8x104xf32> -> vector<8x104xf32>
    %cst_21 = arith.constant 0.000000e+00 : f32
    %35 = vector.broadcast %cst_21 : f32 to vector<8x104xf32>
    %36 = arith.cmpf ogt, %34, %35 : vector<8x104xf32>
    %cst_22 = arith.constant 1.000000e+00 : f32
    %37 = vector.broadcast %cst_22 : f32 to vector<8x104xf32>
    %38 = arith.select %36, %34, %37 : vector<8x104xi1>, vector<8x104xf32>
    %39 = tpu.reciprocal %38 {approx = true} : vector<8x104xf32> -> vector<8x104xf32>
    %40 = arith.mulf %33, %39 : vector<8x104xf32>
    %cst_23 = arith.constant dense<0.000000e+00> : vector<104x16xf32>
    %41 = tpu.matmul %4, %16, %cst_23 {dimension_numbers = #tpu.dot_dimension_numbers<[1], [0], [0], [1], [0, 0, 1, 1], [], []>} : vector<104x26xf32>, vector<26x16xf32>, vector<104x16xf32> -> vector<104x16xf32>
    %42 = arith.mulf %41, %5 : vector<104x16xf32>
    %cst_24 = arith.constant dense<0.000000e+00> : vector<8x16xf32>
    %43 = tpu.matmul %40, %42, %cst_24 {dimension_numbers = #tpu.dot_dimension_numbers<[1], [0], [0], [1], [0, 0, 1, 1], [], []>} : vector<8x104xf32>, vector<104x16xf32>, vector<8x16xf32> -> vector<8x16xf32>
    %44 = arith.addf %43, %14 : vector<8x16xf32>
    %45 = vector.broadcast %6 : vector<1x16xf32> to vector<8x16xf32>
    %46 = arith.addf %44, %45 : vector<8x16xf32>
    %cst_25 = arith.constant 0.000000e+00 : f32
    %47 = vector.broadcast %cst_25 : f32 to vector<8x16xf32>
    %48 = arith.maximumf %46, %47 : vector<8x16xf32>
    %cst_26 = arith.constant dense<0.000000e+00> : vector<8xf32>
    %49 = vector.multi_reduction <add>, %48, %cst_26 [1] : vector<8x16xf32> to vector<8xf32>
    %50 = vector.shape_cast %49 : vector<8xf32> to vector<8x1xf32>
    %cst_27 = arith.constant 1.600000e+01 : f32
    %51 = vector.broadcast %cst_27 : f32 to vector<8x1xf32>
    %52 = arith.divf %50, %51 : vector<8x1xf32>
    %53 = vector.broadcast %52 : vector<8x1xf32> to vector<8x16xf32>
    %54 = arith.subf %48, %53 : vector<8x16xf32>
    %55 = arith.mulf %54, %54 : vector<8x16xf32>
    %cst_28 = arith.constant dense<0.000000e+00> : vector<8xf32>
    %56 = vector.multi_reduction <add>, %55, %cst_28 [1] : vector<8x16xf32> to vector<8xf32>
    %57 = vector.shape_cast %56 : vector<8xf32> to vector<8x1xf32>
    %cst_29 = arith.constant 1.600000e+01 : f32
    %58 = vector.broadcast %cst_29 : f32 to vector<8x1xf32>
    %59 = arith.divf %57, %58 : vector<8x1xf32>
    %60 = vector.broadcast %52 : vector<8x1xf32> to vector<8x16xf32>
    %61 = arith.subf %48, %60 : vector<8x16xf32>
    %cst_30 = arith.constant 9.99999974E-6 : f32
    %62 = vector.broadcast %cst_30 : f32 to vector<8x1xf32>
    %63 = arith.addf %59, %62 : vector<8x1xf32>
    %64 = math.rsqrt %63 : vector<8x1xf32>
    %65 = vector.broadcast %64 : vector<8x1xf32> to vector<8x16xf32>
    %66 = arith.mulf %61, %65 : vector<8x16xf32>
    %67 = vector.broadcast %7 : vector<1x16xf32> to vector<8x16xf32>
    %68 = arith.mulf %66, %67 : vector<8x16xf32>
    %69 = vector.broadcast %8 : vector<1x16xf32> to vector<8x16xf32>
    %70 = arith.addf %68, %69 : vector<8x16xf32>
    %c0_31 = arith.constant 0 : index
    %c0_32 = arith.constant 0 : index
    %71 = vector.load %arg4[%c0_31, %c0_32] : memref<8x16xf32, #tpu.memory_space<vmem>>, vector<8x16xf32>
    tpu.vector_store %arg4[%c0_31, %c0_32], %70 {strides = array<i32>} : memref<8x16xf32, #tpu.memory_space<vmem>>, vector<8x16xf32>,
    return
  }
}

</mosaic_0001>

<bundles_post_ra>
// kernel: tile.29
= control target key start
LH: loop header
LB: loop body
LE: loop exit
PB: predicated region body
PF: predicated region fallthrough
CT: control target
= control target key end

     0   :  { %vm42_vm0 = vcmask 1047556   ;;  %vm44_vm1 = vcmask 48128   ;;  %s93_s22 = smov 6   ;;  %s94_s25 = smov 12   ;;  %vm54_vm2 = vcmask 195728   ;;  %vm64_vm3 = vcmask 146528   ;;  %s146_s0 = inlined_call_operand.vmem [shape: f32[8,4,6], index: 0, kind: input, shape index: {}]   ;;  %s147_s1 = inlined_call_operand.vmem [shape: f32[8,24], index: 1, kind: output, shape index: {}]  }
   0x1   :  { %v82_v0 = vld [vmem:[%s146_s0 + $0x1c] sm:$0xf]  ;;  %v83_v1 = vld [vmem:[%s146_s0 + $0x18] sm:$0xf]  ;;  %v84_v2 = vld [vmem:[%s146_s0 + $0x14] sm:$0xf] }
   0x2   :  { %8 = vst [vmem:[#allocation0 + $0x38] sm:$0xf] %v82_v0  ;;  %13 = vst [vmem:[#allocation0 + $0x30] sm:$0xf] %v83_v1  ;;  %v85_v3 = vld [vmem:[%s146_s0 + $0x10] sm:$0xf] }
   0x3   :  { %18 = vst [vmem:[#allocation0 + $0x28] sm:$0xf] %v84_v2  ;;  %v86_v4 = vld [vmem:[%s146_s0 + $0xc] sm:$0xf]  ;;  %v87_v5 = vld [vmem:[%s146_s0 + $0x8] sm:$0xf] }
   0x4   :  { %23 = vst [vmem:[#allocation0 + $0x20] sm:$0xf] %v85_v3  ;;  %28 = vst [vmem:[#allocation0 + $0x18] sm:$0xf] %v86_v4  ;;  %v88_v6 = vld [vmem:[%s146_s0 + $0x4] sm:$0xf] }
   0x5   :  { %33 = vst [vmem:[#allocation0 + $0x10] sm:$0xf] %v87_v5  ;;  %v38_v7 = vld [vmem:[%s146_s0] sm:$0xf]  ;;  %37 = vst [vmem:[#allocation0 + $0x8] sm:$0xf] %v88_v6 }
   0x6   :  { %39 = vst [vmem:[#allocation0] sm:$0xf] %v38_v7  ;;  %s92_s0 = smov 18   ;;  %vm74_vm4 = vcmask 97328  }
   0xb   :  { %v49_v8 = vld [vmem:[#allocation0 + $0x3] ss:$8 sm:$0xf0]   ;;  %v59_v9 = vld [vmem:[#allocation0 + $0x2] ss:$8 sm:$0xf0]  }
   0xc   :  { %v69_v14 = vld [vmem:[#allocation0 + $0x1] ss:$8 sm:$0xf0]   ;;  %v41_v17 = vld [vmem:[#allocation0] ss:$8 sm:$0xf0]  }
   0xd   :  { %v47_v10 = vld [vmem:[#allocation0 + $0x3] ss:$8 sm:$0xf]   ;;  %v57_v11 = vld [vmem:[#allocation0 + $0x2] ss:$8 sm:$0xf]  }
   0xe   :  { %v51_v12 = vsel %vm42_vm0, %v49_v8, %v47_v10  ;;  %v67_v13 = vld [vmem:[#allocation0 + $0x1] ss:$8 sm:$0xf]   ;;  %v40_v16 = vld [vmem:[#allocation0] ss:$8 sm:$0xf]   ;;  %v61_v18 = vsel %vm42_vm0, %v59_v9, %v57_v11 }
   0xf   :  { %52 = vrot.lane.b32.xlu0 %v51_v12, %s92_s0  ;;  %v71_v15 = vsel %vm42_vm0, %v69_v14, %v67_v13  ;;  %v43_v19 = vsel %vm42_vm0, %v41_v17, %v40_v16 }
  0x10   :  { %72 = vrot.lane.b32.xlu1 %v71_v15, %s93_s22  ;;  %45 = vst.msk [vmem:[%s147_s1] sm:$0xff] %vm44_vm1, %v43_v19  }
  0x13   :  { %62 = vrot.lane.b32.xlu0 %v61_v18, %s94_s25 }
  0x81   :  { %v53_v20 = vpop.permute.xlu0 %52  }
  0x82   :  { %55 = vst.msk [vmem:[%s147_s1] sm:$0xff] %vm54_vm2, %v53_v20   ;;  %v73_v21 = vpop.permute.xlu1 %72  }
  0x85   :  { %v63_v22 = vpop.permute.xlu0 %62  }
  0x86   :  { %65 = vst.msk [vmem:[%s147_s1] sm:$0xff] %vm64_vm3, %v63_v22  }
  0x87   :  { %75 = vst.msk [vmem:[%s147_s1] sm:$0xff] %vm74_vm4, %v73_v21  }

// kernel: tile.39
= control target key start
LH: loop header
LB: loop body
LE: loop exit
PB: predicated region body
PF: predicated region fallthrough
CT: control target
= control target key end

     0   :  { %vm42_vm0 = vcmask 1047556   ;;  %vm44_vm1 = vcmask 39936   ;;  %s93_s22 = smov 5   ;;  %s94_s25 = smov 10   ;;  %vm54_vm2 = vcmask 162936   ;;  %vm64_vm3 = vcmask 121936   ;;  %s146_s0 = inlined_call_operand.vmem [shape: f32[8,4,5], index: 0, kind: input, shape index: {}]   ;;  %s147_s1 = inlined_call_operand.vmem [shape: f32[8,20], index: 1, kind: output, shape index: {}]  }
   0x1   :  { %v82_v0 = vld [vmem:[%s146_s0 + $0x1c] sm:$0xf]  ;;  %v83_v1 = vld [vmem:[%s146_s0 + $0x18] sm:$0xf]  ;;  %v84_v2 = vld [vmem:[%s146_s0 + $0x14] sm:$0xf] }
   0x2   :  { %8 = vst [vmem:[#allocation0 + $0x38] sm:$0xf] %v82_v0  ;;  %13 = vst [vmem:[#allocation0 + $0x30] sm:$0xf] %v83_v1  ;;  %v85_v3 = vld [vmem:[%s146_s0 + $0x10] sm:$0xf] }
   0x3   :  { %18 = vst [vmem:[#allocation0 + $0x28] sm:$0xf] %v84_v2  ;;  %v86_v4 = vld [vmem:[%s146_s0 + $0xc] sm:$0xf]  ;;  %v87_v5 = vld [vmem:[%s146_s0 + $0x8] sm:$0xf] }
   0x4   :  { %23 = vst [vmem:[#allocation0 + $0x20] sm:$0xf] %v85_v3  ;;  %28 = vst [vmem:[#allocation0 + $0x18] sm:$0xf] %v86_v4  ;;  %v88_v6 = vld [vmem:[%s146_s0 + $0x4] sm:$0xf] }
   0x5   :  { %33 = vst [vmem:[#allocation0 + $0x10] sm:$0xf] %v87_v5  ;;  %v38_v7 = vld [vmem:[%s146_s0] sm:$0xf]  ;;  %37 = vst [vmem:[#allocation0 + $0x8] sm:$0xf] %v88_v6 }
   0x6   :  { %39 = vst [vmem:[#allocation0] sm:$0xf] %v38_v7  ;;  %s92_s0 = smov 15   ;;  %vm74_vm4 = vcmask 80936  }
   0xb   :  { %v49_v8 = vld [vmem:[#allocation0 + $0x3] ss:$8 sm:$0xf0]   ;;  %v59_v9 = vld [vmem:[#allocation0 + $0x2] ss:$8 sm:$0xf0]  }
   0xc   :  { %v69_v14 = vld [vmem:[#allocation0 + $0x1] ss:$8 sm:$0xf0]   ;;  %v41_v17 = vld [vmem:[#allocation0] ss:$8 sm:$0xf0]  }
   0xd   :  { %v47_v10 = vld [vmem:[#allocation0 + $0x3] ss:$8 sm:$0xf]   ;;  %v57_v11 = vld [vmem:[#allocation0 + $0x2] ss:$8 sm:$0xf]  }
   0xe   :  { %v51_v12 = vsel %vm42_vm0, %v49_v8, %v47_v10  ;;  %v67_v13 = vld [vmem:[#allocation0 + $0x1] ss:$8 sm:$0xf]   ;;  %v40_v16 = vld [vmem:[#allocation0] ss:$8 sm:$0xf]   ;;  %v61_v18 = vsel %vm42_vm0, %v59_v9, %v57_v11 }
   0xf   :  { %52 = vrot.lane.b32.xlu0 %v51_v12, %s92_s0  ;;  %v71_v15 = vsel %vm42_vm0, %v69_v14, %v67_v13  ;;  %v43_v19 = vsel %vm42_vm0, %v41_v17, %v40_v16 }
  0x10   :  { %72 = vrot.lane.b32.xlu1 %v71_v15, %s93_s22  ;;  %45 = vst.msk [vmem:[%s147_s1] sm:$0xff] %vm44_vm1, %v43_v19  }
  0x13   :  { %62 = vrot.lane.b32.xlu0 %v61_v18, %s94_s25 }
  0x81   :  { %v53_v20 = vpop.permute.xlu0 %52  }
  0x82   :  { %55 = vst.msk [vmem:[%s147_s1] sm:$0xff] %vm54_vm2, %v53_v20   ;;  %v73_v21 = vpop.permute.xlu1 %72  }
  0x85   :  { %v63_v22 = vpop.permute.xlu0 %62  }
  0x86   :  { %65 = vst.msk [vmem:[%s147_s1] sm:$0xff] %vm64_vm3, %v63_v22  }
  0x87   :  { %75 = vst.msk [vmem:[%s147_s1] sm:$0xff] %vm74_vm4, %v73_v21  }

// kernel: forward.1
= control target key start
LH: loop header
LB: loop body
LE: loop exit
PB: predicated region body
PF: predicated region fallthrough
CT: control target
= control target key end

     0   :  { %vm156_vm0 = vcmask 367616   ;;  %vm169_vm1 = vcmask 1044480   ;;  %v1009_v9 = vmov 0.0|0.0   ;;  %vm1010_vm2 = vmmov 1   ;;  %s1011_s5 = smov 16   ;;  %s1328_s0 = inlined_call_operand.vmem [shape: f32[8,12], index: 0, kind: input, shape index: {}]   ;;  %s1329_s1 = inlined_call_operand.vmem [shape: f32[26,45], index: 1, kind: input, shape index: {}]   ;;  %s1330_s2 = inlined_call_operand.vmem [shape: f32[8,104], index: 2, kind: input, shape index: {}]   ;;  %s1331_s3 = inlined_call_operand.vmem [shape: f32[416,128], index: 3, kind: input, shape index: {}]   ;;  %s1332_s4 = inlined_call_operand.hbm [shape: f32[8,16], index: 4, kind: output, shape index: {}]  }
   0x1   :  { %v20_v0 = vld [vmem:[%s1331_s3 + $0x10] sm:$0xff]  ;;  %v21_v1 = vld [vmem:[%s1331_s3 + $0x18] sm:$0xff]  ;;  %v22_v2 = vld [vmem:[%s1331_s3 + $0x20] sm:$0xff]  ;;  %910 = vmatprep.subr.bf16.mxu0 %v1009_v9  ;;  %vm82_vm4 = vcmask 1043456   ;;  %vm1012_vm5 = vmmov 0   ;;  %v1013_v19 = vmov 0.0  }
   0x2   :  { %v914_v3 = vpack.c.bf16 %v21_v1, %v20_v0  ;;  %v23_v4 = vld [vmem:[%s1331_s3 + $0x28] sm:$0xff]  ;;  %v24_v6 = vld [vmem:[%s1331_s3 + $0x30] sm:$0xff]  ;;  %v25_v7 = vld [vmem:[%s1331_s3 + $0x38] sm:$0x1f]  ;;  %784 = vmatprep.mubr.msk.f32.mxu0 %vm1012_vm5, %v1013_v19 }
   0x3   :  { %v918_v5 = vpack.c.bf16 %v23_v4, %v22_v2  ;;  %v73_v8 = vld [vmem:[%s1329_s1] sm:$0xff]  ;;  %vm1069_vm3 = vmpackc.low %vm169_vm1, %vm1010_vm2  ;;  %v28_v12 = vld [vmem:[%s1331_s3 + $0x50] sm:$0xff]  ;;  %v922_v13 = vpack.c.bf16 %v25_v7, %v24_v6 }
   0x4   :  { %915 = vmatprep.subr.bf16.mxu1 %v914_v3  ;;  %799 = vmatprep.mubr.msk.f32.mxu1 %vm156_vm0, %v73_v8  ;;  %v26_v10 = vld [vmem:[%s1331_s3 + $0x40] sm:$0xff]  ;;  %v27_v14 = vld [vmem:[%s1331_s3 + $0x48] sm:$0xff]  ;;  %v29_v17 = vld [vmem:[%s1331_s3 + $0x58] sm:$0x3] }
   0x5   :  { %917 = vmatpush3.bf16.msra.mxu1 %v914_v3  ;;  %262 = vrot.lane.b32.xlu0 %v26_v10, %s1011_s5  ;;  %v18_v15 = vld [vmem:[%s1331_s3] sm:$0xff]  ;;  %v19_v16 = vld [vmem:[%s1331_s3 + $0x8] sm:$0xf] }
   0x6   :  { %919 = vmatprep.subr.bf16.mxu1 %v918_v5  ;;  %266 = vrot.lane.b32.xlu1 %v28_v12, %s1011_s5  ;;  %v911_v18 = vpack.c.bf16 %v19_v16, %v18_v15 }
   0x7   :  { %9 = vsyncpa [#allocation3], 0  ;;  %v72_v20 = vld [vmem:[%s1328_s0] sm:$0xff]  ;;  %vm78_vm7 = vcmask 97280   ;;  %v74_v21 = vld [vmem:[%s1329_s1 + $0x8] sm:$0xff]  ;;  %vm278_vm8 = vcmask 982144  }
   0x8   :  { %vm912_vm6 = vmpackc.low %vm82_vm4, %vm1010_vm2  ;;  %v75_v22 = vld [vmem:[%s1329_s1 + $0x10] sm:$0xff]  ;;  %v76_v23 = vld [vmem:[%s1329_s1 + $0x18] sm:$0x3]  ;;  %vm426_vm9 = vcmask 1041408   ;;  %vm284_vm11 = vcmask 976000   ;;  %vm386_vm12 = vcmask 211968  }
   0x9   :  { %921 = vmatpush3.bf16.msra.mxu1 %v918_v5  ;;  %264 = vrot.lane.b32.xlu0 %v27_v14, %s1011_s5  ;;  %vm951_vm10 = vmpackc.low %vm426_vm9, %vm1010_vm2  ;;  %v43_v50 = vld [vmem:[%s1331_s3 + $0xc8] sm:$0xff]  ;;  %v30_v52 = vld [vmem:[%s1331_s3 + $0x60] sm:$0xff]  ;;  %s1014_s10 = smov 112   ;;  %s1015_s13 = smov 24   ;;  %vm301_vm14 = vcmask 850944  }
   0xa   :  { %924 = vmatprep.subr.msk.bf16.mxu1 %vm1069_vm3, %v922_v13  ;;  %268 = vrot.lane.b32.xlu1 %v29_v17, %s1011_s5  ;;  %v44_v53 = vld [vmem:[%s1331_s3 + $0xd0] sm:$0xff]  ;;  %v31_v54 = vld [vmem:[%s1331_s3 + $0x68] sm:$0xff]  ;;  %v33_v58 = vld [vmem:[%s1331_s3 + $0x78] sm:$0xff]  ;;  %s1016_s25 = smov [#allocation2]  }
   0xb   :  { %913 = vmatpush3.bf16.msk.msra.mxu0 %vm912_vm6, %v911_v18  ;;  %v32_v55 = vld [vmem:[%s1331_s3 + $0x70] sm:$0xff]  ;;  %v929_v57 = vpack.c.bf16 %v31_v54, %v30_v52  ;;  %v45_v61 = vld [vmem:[%s1331_s3 + $0xd8] sm:$0xff]  ;;  %v46_v62 = vld [vmem:[%s1331_s3 + $0xe0] sm:$0xff]  ;;  %s688_s26 = sshll.u32 %s1016_s25, 4  ;;  %s689_s26 = int_to_ptr.vmem [resolvable:$true] %s688_s26 }
   0xc   :  { %928 = vmatprep.subr.bf16.mxu0 %v1009_v9  ;;  %v932_v60 = vpack.c.bf16 %v33_v58, %v32_v55  ;;  %v47_v63 = vld [vmem:[%s1331_s3 + $0xe8] sm:$0xff]  ;;  %v48_v0 = vld [vmem:[%s1331_s3 + $0xf0] sm:$0xff]  ;;  %v49_v1 = vld [vmem:[%s1331_s3 + $0xf8] sm:$0xff]  ;;  %s985_s27 = scalar_lea.vmem %s689_s26, 128  ;;  %p990_p1 = scmp.lt.s32.totalorder %s689_s26, %s689_s26 }
   0xd   :  { %927 = vmatpush3.bf16.msk.msra.mxu1 %vm1069_vm3, %v922_v13  ;;  %v34_v7 = vld [vmem:[%s1331_s3 + $0x80] sm:$0xff]  ;;  %v35_v8 = vld [vmem:[%s1331_s3 + $0x88] sm:$0xff]  ;;  %v36_v11 = vld [vmem:[%s1331_s3 + $0x90] sm:$0xff]  ;;  %p986_p0 = scmp.ne.s32.totalorder %s689_s26, %s985_s27  ;;  %p991_p2 = scmp.lt.s32.totalorder %s985_s27, %s985_s27 }
   0xe   :  { %785 = vmatmul.mubr.msk.f32.vlgmr.msra.gmra.mrb[0].mxu0 %vm78_vm7, %v72_v20  ;;  %946 = vmatprep.subr.bf16.mxu1 %v1009_v9  ;;  %v935_v10 = vpack.c.bf16 %v35_v8, %v34_v7  ;;  %v37_v12 = vld [vmem:[%s1331_s3 + $0x98] sm:$0xff]  ;;  %v50_v13 = vld [vmem:[%s1331_s3 + $0x100] sm:$0xff]  ;;  %v51_v15 = vld [vmem:[%s1331_s3 + $0x108] sm:$0xff] }
   0xf   :  { %831 = vmatprep.mubr.msk.f32.mxu0 %vm1012_vm5, %v1013_v19  ;;  %930 = vmatpush3.bf16.msra.mxu0 %v929_v57  ;;  %v938_v14 = vpack.c.bf16 %v37_v12, %v36_v11  ;;  %v38_v16 = vld [vmem:[%s1331_s3 + $0xa0] sm:$0xff]  ;;  %v39_v17 = vld [vmem:[%s1331_s3 + $0xa8] sm:$0xff]  ;;  %v40_v20 = vld [vmem:[%s1331_s3 + $0xb0] sm:$0xff]  ;;  %p992_p3 = por %p991_p2, %p990_p1 }
  0x10   :  { %800 = vmatmul.mubr.msk.f32.vlgmr.msra.gmra.mrb[0].mxu1 %vm156_vm0, %v74_v21  ;;  %931 = vmatprep.subr.bf16.mxu0 %v1009_v9  ;;  %v941_v18 = vpack.c.bf16 %v39_v17, %v38_v16  ;;  %v41_v21 = vld [vmem:[%s1331_s3 + $0xb8] sm:$0xff] }
  0x11   :  { %802 = vmatprep.mubr.msk.f32.mxu1 %vm156_vm0, %v75_v22  ;;  %v52_v22 = vld [vmem:[%s1331_s3 + $0x110] sm:$0xff]  ;;  %p993_p4 = pnand %p992_p3, %p986_p0 }
  0x13   :  { %933 = vmatpush3.bf16.msra.mxu0 %v932_v60  ;;  %v77_v60 = vld [vmem:[%s1330_s2] sm:$0xff] }
  0x14   :  { %803 = vmatmul.mubr.msk.f32.gmra.mrb[2].mxu1 %vm156_vm0, %v76_v23  ;;  %934 = vmatprep.subr.bf16.mxu0 %v1009_v9  ;;  %v944_v23 = vpack.c.bf16 %v41_v21, %v40_v20  ;;  %v67_v20 = vld [vmem:[%s1331_s3 + $0x188] sm:$0xff]  ;;  %vm656_vm0 = vcmask 130048  }
  0x15   :  { %842 = vmatprep.mubr.msk.f32.mxu1 %vm1012_vm5, %v1013_v19 }
  0x17   :  { %936 = vmatpush3.bf16.msra.mxu0 %v935_v10  ;;  %v65_v10 = vld [vmem:[%s1331_s3 + $0x178] sm:$0xff] }
  0x18   :  { %937 = vmatprep.subr.bf16.mxu0 %v1009_v9 }
  0x1b   :  { %939 = vmatpush3.bf16.msra.mxu0 %v938_v14 }
  0x1c   :  { %940 = vmatprep.subr.bf16.mxu0 %v1009_v9 }
  0x1f   :  { %942 = vmatpush3.bf16.msra.mxu0 %v941_v18  ;;  %v66_v18 = vld [vmem:[%s1331_s3 + $0x180] sm:$0xff] }
  0x20   :  { %943 = vmatprep.subr.bf16.mxu0 %v1009_v9 }
  0x23   :  { %945 = vmatpush3.bf16.msra.mxu0 %v944_v23 }
  0x24   :  { %829 = vmatprep.subr.mxu0 %v1013_v19 }
  0x77   :  { %v263_v24 = vpop.permute.xlu0 %262 }
  0x78   :  { %v267_v25 = vpop.permute.xlu1 %266 }
  0x7b   :  { %v265_v26 = vpop.permute.xlu0 %264 }
  0x7c   :  { %v269_v35 = vpop.permute.xlu1 %268 }
  0xe1   :  { %v1116_v27 = vpop.f32.mrb[0].mxu0 }
  0xe2   :  { %v786_v28 = vpop.f32.mrb[1].mxu0 }
  0xe3   :  { %v801_v29 = vpop.f32.mrb[0].mxu1  ;;  %v56_v28 = vld [vmem:[%s1331_s3 + $0x130] sm:$0xff] }
  0xe4   :  { %v275_v30 = vmul.f32 %v801_v29, %v265_v26  ;;  %v239_v31 = vpop.f32.mrb[1].mxu1  ;;  %v54_v26 = vld [vmem:[%s1331_s3 + $0x120] sm:$0xff] }
  0xe5   :  { %v274_v32 = vmul.f32 %v263_v24, %v239_v31  ;;  %v947_v33 = vpack.c.bf16 %v801_v29, %v239_v31  ;;  %v53_v24 = vld [vmem:[%s1331_s3 + $0x118] sm:$0xff] }
  0xe6   :  { %v280_v34 = vsel %vm278_vm8, %v275_v30, 0.0  ;;  %v57_v31 = vld [vmem:[%s1331_s3 + $0x138] sm:$0xff] }
  0xe7   :  { %v279_v36 = vsel %vm278_vm8, %v274_v32, 0.0  ;;  %v804_v37 = vpop.f32.mrb[2].mxu1  ;;  %948 = vmatpush3.bf16.msra.mxu1 %v947_v33 }
  0xe8   :  { %v281_v38 = vadd.f32 %v280_v34, %v279_v36  ;;  %v249_v39 = vpop.f32.mrb[3].mxu1  ;;  %949 = vmatprep.subr.bf16.mxu1 %v1009_v9  ;;  %v277_v40 = vmul.f32 %v804_v37, %v269_v35 }
  0xe9   :  { %v276_v41 = vmul.f32 %v267_v25, %v249_v39  ;;  %v950_v42 = vpack.c.bf16 %v804_v37, %v249_v39  ;;  %v42_v25 = vld [vmem:[%s1331_s3 + $0xc0] sm:$0xff] }
  0xea   :  { %v285_v45 = vsel %vm284_vm11, %v277_v40, 0.0  ;;  %830 = vmatpush3.msra.mxu0 %v42_v25  ;;  %v58_v37 = vld [vmem:[%s1331_s3 + $0x140] sm:$0xff]  ;;  %v59_v40 = vld [vmem:[%s1331_s3 + $0x148] sm:$0xff]  ;;  %v68_v25 = vld [vmem:[%s1331_s3 + $0x190] sm:$0xff] }
  0xeb   :  { %v282_v43 = vsel %vm278_vm8, %v276_v41, 0.0  ;;  %952 = vmatpush3.bf16.msk.msra.mxu1 %vm951_vm10, %v950_v42  ;;  %953 = vmatprep.subr.bf16.mxu0 %v1009_v9 }
  0xec   :  { %v283_v44 = vadd.f32 %v282_v43, %v281_v38 }
  0xee   :  { %v286_v46 = vadd.f32 %v285_v45, %v283_v44  ;;  %843 = vmatmul.mubr.msk.f32.vlgmr.msra.gmra.mrb[4].mxu1 %vm386_vm12, %v43_v50 }
  0xef   :  { %845 = vmatprep.mubr.msk.f32.mxu1 %vm1012_vm5, %v1013_v19 }
  0xf0   :  { %v287_v47 = vrot.slane %v286_v46, 4 }
  0xf2   :  { %v288_v48 = vadd.f32 %v287_v47, %v286_v46  ;;  %846 = vmatmul.mubr.msk.f32.gmra.mrb[6].mxu1 %vm386_vm12, %v44_v53  ;;  %v60_v46 = vld [vmem:[%s1331_s3 + $0x150] sm:$0xff] }
  0xf3   :  { %848 = vmatprep.mubr.msk.f32.mxu1 %vm1012_vm5, %v1013_v19 }
  0xf4   :  { %v289_v49 = vrot.slane %v288_v48, 2 }
  0xf6   :  { %v290_v51 = vadd.f32 %v289_v49, %v288_v48  ;;  %849 = vmatmul.mubr.msk.f32.gmra.mrb[8].mxu1 %vm386_vm12, %v45_v61  ;;  %v61_v49 = vld [vmem:[%s1331_s3 + $0x158] sm:$0xff] }
  0xf7   :  { %851 = vmatprep.mubr.msk.f32.mxu1 %vm1012_vm5, %v1013_v19 }
  0xf8   :  { %v291_v56 = vrot.slane %v290_v51, 1 }
  0xfa   :  { %v292_v59 = vadd.f32 %v291_v56, %v290_v51  ;;  %852 = vmatmul.mubr.msk.f32.gmra.mrb[10].mxu1 %vm386_vm12, %v46_v62 }
  0xfb   :  { %854 = vmatprep.mubr.msk.f32.mxu1 %vm1012_vm5, %v1013_v19 }
  0xfc   :  { %294 = vrot.lane.b32.xlu0 %v292_v59, %s1014_s10 }
  0xfe   :  { %855 = vmatmul.mubr.msk.f32.gmra.mrb[12].mxu1 %vm386_vm12, %v47_v63  ;;  %v62_v63 = vld [vmem:[%s1331_s3 + $0x160] sm:$0xff] }
  0xff   :  { %857 = vmatprep.mubr.msk.f32.mxu1 %vm1012_vm5, %v1013_v19 }
 0x100   :  { %574 = vrot.lane.b32.xlu0 %v1116_v27, %s1015_s13 }
 0x102   :  { %858 = vmatmul.mubr.msk.f32.gmra.mrb[14].mxu1 %vm386_vm12, %v48_v0  ;;  %v63_v0 = vld [vmem:[%s1331_s3 + $0x168] sm:$0xff] }
 0x103   :  { %860 = vmatprep.mubr.msk.f32.mxu1 %vm1012_vm5, %v1013_v19 }
 0x106   :  { %861 = vmatmul.mubr.msk.f32.gmra.mrb[16].mxu1 %vm386_vm12, %v49_v1 }
 0x107   :  { %863 = vmatprep.mubr.msk.f32.mxu1 %vm1012_vm5, %v1013_v19 }
 0x10a   :  { %864 = vmatmul.mubr.msk.f32.gmra.mrb[18].mxu1 %vm386_vm12, %v50_v13 }
 0x10b   :  { %866 = vmatprep.mubr.msk.f32.mxu1 %vm1012_vm5, %v1013_v19 }
 0x10e   :  { %867 = vmatmul.mubr.msk.f32.gmra.mrb[20].mxu1 %vm386_vm12, %v51_v15 }
 0x10f   :  { %869 = vmatprep.mubr.msk.f32.mxu1 %vm1012_vm5, %v1013_v19 }
 0x112   :  { %870 = vmatmul.mubr.msk.f32.gmra.mrb[22].mxu1 %vm386_vm12, %v52_v22 }
 0x113   :  { %872 = vmatprep.mubr.msk.f32.mxu1 %vm1012_vm5, %v1013_v19 }
 0x116   :  { %873 = vmatmul.mubr.msk.f32.gmra.mrb[24].mxu1 %vm386_vm12, %v53_v24 }
 0x117   :  { %875 = vmatprep.mubr.msk.f32.mxu1 %vm1012_vm5, %v1013_v19 }
 0x11a   :  { %876 = vmatmul.mubr.msk.f32.gmra.mrb[26].mxu1 %vm386_vm12, %v54_v26 }
 0x11b   :  { %878 = vmatprep.mubr.msk.f32.mxu1 %vm1012_vm5, %v1013_v19 }
 0x16e   :  { %v295_v2 = vpop.permute.xlu0 %294 }
 0x16f   :  { %v297_v3 = vadd.f32 %v295_v2, %v1116_v27  ;;  %v55_v27 = vld [vmem:[%s1331_s3 + $0x128] sm:$0xff] }
 0x170   :  { %879 = vmatmul.mubr.msk.f32.gmra.mrb[28].mxu1 %vm386_vm12, %v55_v27 }
 0x171   :  { %v299_v4 = vmul.f32 0.2, %v297_v3  ;;  %vm298_vm13 = vcmp.ge.f32.partialorder %v297_v3, 0.0 }
 0x173   :  { %v1181_v5 = vsel %vm298_vm13, %v297_v3, %v299_v4 }
 0x174   :  { %v302_v6 = vsel %vm301_vm14, %v1181_v5, -inf }
 0x175   :  { %303 = vmax.xlane.f32.xlu1 %v302_v6  ;;  %v64_v6 = vld [vmem:[%s1331_s3 + $0x170] sm:$0xff] }
 0x1c1   :  { %v496_v29 = vpop.f32.mrb[4].mxu1 }
 0x1c2   :  { %v844_v30 = vpop.f32.mrb[5].mxu1  ;;  %v560_v32 = vmul.f32 %v496_v29, %v56_v28 }
 0x1c5   :  { %v501_v33 = vpop.f32.mrb[6].mxu1 }
 0x1c6   :  { %v561_v34 = vmul.f32 %v501_v33, %v57_v31  ;;  %v847_v35 = vpop.f32.mrb[7].mxu1 }
 0x1c7   :  { %v719_v35 = vld [vmem:[%s1331_s3 + $0x198] ss:$0 sm:$0xff] }
 0x1c8   :  { %v954_v36 = vpack.c.bf16 %v561_v34, %v560_v32  ;;  %v575_v34 = vpop.permute.xlu0 %574 }
 0x1c9   :  { %v506_v38 = vpop.f32.mrb[8].mxu1 }
 0x1ca   :  { %v850_v39 = vpop.f32.mrb[9].mxu1  ;;  %v562_v41 = vmul.f32 %v506_v38, %v58_v37 }
 0x1cd   :  { %v511_v42 = vpop.f32.mrb[10].mxu1 }
 0x1ce   :  { %v563_v43 = vmul.f32 %v511_v42, %v59_v40  ;;  %v853_v44 = vpop.f32.mrb[11].mxu1 }
 0x1d0   :  { %v957_v45 = vpack.c.bf16 %v563_v43, %v562_v41 }
 0x1d1   :  { %v516_v47 = vpop.f32.mrb[12].mxu1 }
 0x1d2   :  { %v856_v48 = vpop.f32.mrb[13].mxu1  ;;  %v564_v50 = vmul.f32 %v516_v47, %v60_v46 }
 0x1d5   :  { %v521_v51 = vpop.f32.mrb[14].mxu1 }
 0x1d6   :  { %v565_v52 = vmul.f32 %v521_v51, %v61_v49  ;;  %v859_v53 = vpop.f32.mrb[15].mxu1 }
 0x1d8   :  { %v960_v54 = vpack.c.bf16 %v565_v52, %v564_v50  ;;  %v720_v50 = vld [vmem:[%s1331_s3 + $0x199] ss:$0 sm:$0xff]  ;;  %v721_v52 = vld [vmem:[%s1331_s3 + $0x19a] ss:$0 sm:$0xff] }
 0x1d9   :  { %v526_v55 = vpop.f32.mrb[16].mxu1 }
 0x1da   :  { %v862_v56 = vpop.f32.mrb[17].mxu1  ;;  %v566_v1 = vmul.f32 %v526_v55, %v62_v63 }
 0x1dd   :  { %v531_v2 = vpop.f32.mrb[18].mxu1 }
 0x1de   :  { %v567_v3 = vmul.f32 %v531_v2, %v63_v0  ;;  %v865_v4 = vpop.f32.mrb[19].mxu1 }
 0x1e1   :  { %v536_v7 = vpop.f32.mrb[20].mxu1 }
 0x1e2   :  { %v868_v8 = vpop.f32.mrb[21].mxu1  ;;  %v568_v11 = vmul.f32 %v536_v7, %v64_v6 }
 0x1e5   :  { %v541_v12 = vpop.f32.mrb[22].mxu1 }
 0x1e6   :  { %v569_v13 = vmul.f32 %v541_v12, %v65_v10  ;;  %v871_v14 = vpop.f32.mrb[23].mxu1 }
 0x1e8   :  { %v966_v15 = vpack.c.bf16 %v569_v13, %v568_v11 }
 0x1e9   :  { %v546_v16 = vpop.f32.mrb[24].mxu1 }
 0x1ea   :  { %v874_v17 = vpop.f32.mrb[25].mxu1  ;;  %v570_v22 = vmul.f32 %v546_v16, %v66_v18 }
 0x1ed   :  { %v551_v21 = vpop.f32.mrb[26].mxu1 }
 0x1ee   :  { %v571_v23 = vmul.f32 %v551_v21, %v67_v20  ;;  %v877_v24 = vpop.f32.mrb[27].mxu1 }
 0x1f0   :  { %v969_v26 = vpack.c.bf16 %v571_v23, %v570_v22 }
 0x202   :  { %v304_v57 = vpop.xlane.xlu1 %303 }
 0x203   :  { %v305_v58 = vsub.f32 %v1181_v5, %v304_v57  ;;  %v963_v5 = vpack.c.bf16 %v567_v3, %v566_v1 }
 0x205   :  { %v306_v59 = vmul.f32 1.442695, %v305_v58 }
 0x207   :  { %979 = vpow2.f32 %v306_v59 }
 0x211   :  { %v980_v61 = vpop.eup %979 }
 0x212   :  { %v308_v62 = vmul.f32 %v980_v61, %v77_v60 }
 0x214   :  { %832 = vmatmul.mubr.msk.f32.vlgmr.msra.gmra.mrb[2].mxu0 %vm301_vm14, %v308_v62 }
 0x215   :  { %955 = vmatpush3.bf16.msra.mxu0 %v954_v36  ;;  %907 = vmatprep.mubr.msk.f32.mxu0 %vm1012_vm5, %v1013_v19 }
 0x216   :  { %956 = vmatprep.subr.bf16.mxu0 %v1009_v9 }
 0x219   :  { %958 = vmatpush3.bf16.msra.mxu0 %v957_v45 }
 0x21a   :  { %959 = vmatprep.subr.bf16.mxu0 %v1009_v9 }
 0x21d   :  { %961 = vmatpush3.bf16.msra.mxu0 %v960_v54 }
 0x21e   :  { %962 = vmatprep.subr.bf16.mxu0 %v1009_v9 }
 0x221   :  { %964 = vmatpush3.bf16.msra.mxu0 %v963_v5 }
 0x222   :  { %965 = vmatprep.subr.bf16.mxu0 %v1009_v9 }
 0x225   :  { %967 = vmatpush3.bf16.msra.mxu0 %v966_v15 }
 0x226   :  { %968 = vmatprep.subr.bf16.mxu0 %v1009_v9 }
 0x229   :  { %970 = vmatpush3.bf16.msra.mxu0 %v969_v26 }
 0x22a   :  { %905 = vmatprep.subr.mxu0 %v1013_v19 }
 0x243   :  { %v556_v27 = vpop.f32.mrb[28].mxu1 }
 0x244   :  { %v572_v9 = vmul.f32 %v556_v27, %v68_v25  ;;  %v880_v28 = vpop.f32.mrb[29].mxu1 }
 0x246   :  { %906 = vmatpush3.msra.mxu0 %v572_v9 }
 0x2e7   :  { %v378_v29 = vpop.f32.mrb[2].mxu0 }
 0x2e8   :  { %vm382_vm15 = vcmp.gt.f32.partialorder %v378_v29, 0.0  ;;  %v833_v30 = vpop.f32.mrb[3].mxu0 }
 0x2e9   :  { %v383_v31 = vsel %vm382_vm15, %v378_v29, 1.0 }
 0x2ea   :  { %981 = vrcp.f32 %v383_v31 }
 0x2f4   :  { %v982_v32 = vpop.eup %981 }
 0x2f5   :  { %v385_v33 = vmul.f32 %v982_v32, %v308_v62 }
 0x2f7   :  { %908 = vmatmul.mubr.msk.f32.vlgmr.msra.gmra.mrb[4].mxu0 %vm301_vm14, %v385_v33 }
 0x3ca   :  { %v646_v36 = vpop.f32.mrb[4].mxu0 }
 0x3cb   :  { %v647_v37 = vadd.f32 %v646_v36, %v575_v34  ;;  %v909_v38 = vpop.f32.mrb[5].mxu0 }
 0x3cd   :  { %v654_v39 = vadd.f32 %v719_v35, %v647_v37 }
 0x3cf   :  { %v655_v19 = vmax.f32 %v654_v39, 0.0 }
 0x3d1   :  { %v657_v40 = vsel %vm656_vm0, %v655_v19, 0.0 }
 0x3d2   :  { %658 = vadd.xlane.f32.xlu0 %v657_v40 }
 0x45f   :  { %v659_v41 = vpop.xlane.xlu0 %658 }
 0x460   :  { %v661_v42 = vmul.f32 0.0625, %v659_v41 }
 0x462   :  { %v662_v43 = vsub.f32 %v655_v19, %v661_v42 }
 0x464   :  { %v663_v44 = vmul.f32 %v662_v43, %v662_v43 }
 0x466   :  { %v664_v45 = vsel %vm656_vm0, %v663_v44, 0.0 }
 0x467   :  { %665 = vadd.xlane.f32.xlu1 %v664_v45 }
 0x4f4   :  { %v666_v46 = vpop.xlane.xlu1 %665 }
 0x4f5   :  { %v667_v47 = vmul.f32 0.0625, %v666_v46 }
 0x4f7   :  { %v668_v48 = vadd.f32 1e-05, %v667_v47 }
 0x4f9   :  { %983 = vrsqrt.f32 %v668_v48 }
 0x503   :  { %v984_v49 = vpop.eup %983 }
 0x504   :  { %v670_v51 = vmul.f32 %v984_v49, %v662_v43 }
 0x506   :  { %v675_v53 = vmul.f32 %v720_v50, %v670_v51 }
 0x508   :  { %v680_v54 = vadd.f32 %v721_v52, %v675_v53 }
 0x50a   :  { %681 = vst.msk [vmem:[#allocation2] sm:$0xff] %vm656_vm0, %v680_v54 }
 0x50b   :  { %996 = shalt.err (!%p993_p4)
}
 0x50c   :  { %s997_s30 = scalar_lea.hbm %s1332_s4, 128 }
 0x50d   :  { %p998_p5 = scmp.ne.s32.totalorder %s1332_s4, %s997_s30  ;;  %p1001_p6 = scmp.lt.u32.totalorder %s997_s30, %s1332_s4 }
 0x50f   :  { %p1003_p7 = pnand %p1001_p6, %p998_p5 }
 0x511   :  { %1006 = shalt.err (!%p1003_p7)
}
 0x512   :  { %691 = dma.vmem_to_hbm [thread:$0]  %s689_s26, 128, %s1332_s4, [#allocation3]  }
 0x513   :  { %1007 = dma.done.wait [#allocation3], 128  }
 0x514   :  { %1008 = vsyncadd [#allocation3], 4294967168 }
 0x515   :  { %695 = vsyncpa [#allocation3], 1 }

</bundles_post_ra>
